<compile_context>
chip_gen: v7x
topology: tpu7x:2x2x1
jax: 0.10.0
libtpu: 0.0.40
codegen_flags: <defaults>
</compile_context>

<pallas_src>
from functools import partial

import jax
import jax.numpy as jnp
from jax.experimental import pallas as pl
from jax.experimental.pallas import tpu as pltpu


def _mlp_kernel(*refs, n_layers):
    """Fused MLP forward in transposed layout.

    refs = (xT_ref, w1T_ref, b1_ref, w2T_ref, b2_ref, ..., out_ref)
      xT_ref : (n_input, batch)        activations with batch on the lane axis
      wiT_ref: (n_out_i, n_in_i)       pre-transposed weights
      bi_ref : (n_out_i, 1)            bias column (broadcasts over batch/lanes)
      out_ref: (1, batch)              lane-dense final output
    """
    xT_ref = refs[0]
    out_ref = refs[-1]
    param_refs = refs[1:-1]

    h = xT_ref[...]  # (n_in, batch)
    for i in range(n_layers):
        wT = param_refs[2 * i][...]
        b = param_refs[2 * i + 1][...]
        # h_{i+1}^T = W_i^T @ h_i^T + b_i  (MXU matmul, f32 accumulation)
        h = jnp.dot(wT, h, preferred_element_type=jnp.float32) + b
        if i < n_layers - 1:
            h = jnp.maximum(h, 0.0)  # ReLU between layers only
    out_ref[...] = h.astype(out_ref.dtype)  # (1, batch), lane-dense


def init_params(key, input_dim, hidden_sizes):
    """Init matching MAP_Linear_Layer.__init__ (torch normal_(mean, std)):
         W ~ N(0, std = 1/sqrt(4*n_out)),  b ~ N(0, std = 1e-10)
    Stored pre-transposed / pre-shaped for the fused kernel:
         W_T: (n_out, n_in),  b_col: (n_out, 1)
    """
    dims = [input_dim] + list(hidden_sizes) + [1]
    params = []
    for i in range(len(dims) - 1):
        n_in, n_out = dims[i], dims[i + 1]
        key, kw, kb = jax.random.split(key, 3)
        W = jax.random.normal(kw, (n_in, n_out), jnp.float32) / jnp.sqrt(4.0 * n_out)
        b = jax.random.normal(kb, (n_out,), jnp.float32) * 1e-10
        params.append((W.T, b.reshape(n_out, 1)))  # one-time transpose/reshape
    return params


def neural_linear_net_forward(params, s):
    """Replicates Neural_Linear_Net.forward(s): linear layers with activation
    between them (not after the last), returning shape (1, batch) — exactly
    what torch's s.view(1, -1) produces when the last layer has n_output=1.
    """
    batch = s.shape[0]
    n_layers = len(params)

    # Single tiny XLA transpose outside the kernel so the whole network runs
    # lane-dense (batch on the lane axis); replaces the external reshape.
    sT = s.T  # (n_input, batch)

    flat_params = []
    for wT, b_col in params:
        flat_params.extend((wT, b_col))

    vmem_spec = pl.BlockSpec(memory_space=pltpu.MemorySpace.VMEM)
    out = pl.pallas_call(
        partial(_mlp_kernel, n_layers=n_layers),
        out_shape=jax.ShapeDtypeStruct((1, batch), jnp.float32),
        in_specs=[vmem_spec] * (1 + 2 * n_layers),
        out_specs=vmem_spec,
    )(sT, *flat_params)
    return out  # (1, batch)


def _reference_forward(params, s):
    """Pure-JAX reference (untransposed layout) for a correctness check."""
    n_layers = len(params)
    for i, (wT, b_col) in enumerate(params):
        s = s @ wT.T + b_col[:, 0]
        if i < n_layers - 1:
            s = jnp.maximum(s, 0.0)
    return s.reshape(1, -1)


if __name__ == "__main__":
    key = jax.random.PRNGKey(0)
    batch = 8
    input_dim = 4
    hidden_sizes = [32, 32]

    key, kx = jax.random.split(key)
    x = jax.random.normal(kx, (batch, input_dim), jnp.float32)

    params = init_params(key, input_dim, hidden_sizes)

    out = neural_linear_net_forward(params, x)
    out = jax.block_until_ready(out)
    assert out.shape == (1, batch), out.shape

    ref = jax.block_until_ready(_reference_forward(params, x))
    assert jnp.allclose(out, ref, atol=1e-5, rtol=1e-5), (out, ref)

    print("KERNEL_OK")
</pallas_src>

<mosaic_0001>
module attributes {stable_mosaic.version = 11 : i64} {
  func.func @_mlp_kernel(%arg0: memref<4x8xf32, #tpu.memory_space<vmem>>, %arg1: memref<32x4xf32, #tpu.memory_space<vmem>>, %arg2: memref<32x1xf32, #tpu.memory_space<vmem>>, %arg3: memref<32x32xf32, #tpu.memory_space<vmem>>, %arg4: memref<32x1xf32, #tpu.memory_space<vmem>>, %arg5: memref<1x32xf32, #tpu.memory_space<vmem>>, %arg6: memref<1x1xf32, #tpu.memory_space<vmem>>, %arg7: memref<1x8xf32, #tpu.memory_space<vmem>>) attributes {dimension_semantics = [], scalar_prefetch = 0 : i64, scratch_operands = 0 : i64, tpu.core_type = #tpu.core_type<tc>} {
    %c0 = arith.constant 0 : index
    %c0_0 = arith.constant 0 : index
    %0 = vector.load %arg0[%c0, %c0_0] : memref<4x8xf32, #tpu.memory_space<vmem>>, vector<4x8xf32>
    %c0_1 = arith.constant 0 : index
    %c0_2 = arith.constant 0 : index
    %1 = vector.load %arg1[%c0_1, %c0_2] : memref<32x4xf32, #tpu.memory_space<vmem>>, vector<32x4xf32>
    %c0_3 = arith.constant 0 : index
    %c0_4 = arith.constant 0 : index
    %2 = vector.load %arg2[%c0_3, %c0_4] : memref<32x1xf32, #tpu.memory_space<vmem>>, vector<32x1xf32>
    %cst = arith.constant dense<0.000000e+00> : vector<32x8xf32>
    %3 = tpu.matmul %1, %0, %cst {dimension_numbers = #tpu.dot_dimension_numbers<[1], [0], [0], [1], [0, 0, 1, 1], [], []>} : vector<32x4xf32>, vector<4x8xf32>, vector<32x8xf32> -> vector<32x8xf32>
    %4 = vector.broadcast %2 : vector<32x1xf32> to vector<32x8xf32>
    %5 = arith.addf %3, %4 : vector<32x8xf32>
    %cst_5 = arith.constant 0.000000e+00 : f32
    %6 = vector.broadcast %cst_5 : f32 to vector<32x8xf32>
    %7 = arith.maximumf %5, %6 : vector<32x8xf32>
    %c0_6 = arith.constant 0 : index
    %c0_7 = arith.constant 0 : index
    %8 = vector.load %arg3[%c0_6, %c0_7] : memref<32x32xf32, #tpu.memory_space<vmem>>, vector<32x32xf32>
    %c0_8 = arith.constant 0 : index
    %c0_9 = arith.constant 0 : index
    %9 = vector.load %arg4[%c0_8, %c0_9] : memref<32x1xf32, #tpu.memory_space<vmem>>, vector<32x1xf32>
    %cst_10 = arith.constant dense<0.000000e+00> : vector<32x8xf32>
    %10 = tpu.matmul %8, %7, %cst_10 {dimension_numbers = #tpu.dot_dimension_numbers<[1], [0], [0], [1], [0, 0, 1, 1], [], []>} : vector<32x32xf32>, vector<32x8xf32>, vector<32x8xf32> -> vector<32x8xf32>
    %11 = vector.broadcast %9 : vector<32x1xf32> to vector<32x8xf32>
    %12 = arith.addf %10, %11 : vector<32x8xf32>
    %cst_11 = arith.constant 0.000000e+00 : f32
    %13 = vector.broadcast %cst_11 : f32 to vector<32x8xf32>
    %14 = arith.maximumf %12, %13 : vector<32x8xf32>
    %c0_12 = arith.constant 0 : index
    %c0_13 = arith.constant 0 : index
    %15 = vector.load %arg5[%c0_12, %c0_13] : memref<1x32xf32, #tpu.memory_space<vmem>>, vector<1x32xf32>
    %c0_14 = arith.constant 0 : index
    %c0_15 = arith.constant 0 : index
    %16 = vector.load %arg6[%c0_14, %c0_15] : memref<1x1xf32, #tpu.memory_space<vmem>>, vector<1x1xf32>
    %cst_16 = arith.constant dense<0.000000e+00> : vector<1x8xf32>
    %17 = tpu.matmul %15, %14, %cst_16 {dimension_numbers = #tpu.dot_dimension_numbers<[1], [0], [0], [1], [0, 0, 1, 1], [], []>} : vector<1x32xf32>, vector<32x8xf32>, vector<1x8xf32> -> vector<1x8xf32>
    %18 = vector.broadcast %16 : vector<1x1xf32> to vector<1x8xf32>
    %19 = arith.addf %17, %18 : vector<1x8xf32>
    %c0_17 = arith.constant 0 : index
    %c0_18 = arith.constant 0 : index
    %20 = vector.load %arg7[%c0_17, %c0_18] : memref<1x8xf32, #tpu.memory_space<vmem>>, vector<1x8xf32>
    tpu.vector_store %arg7[%c0_17, %c0_18], %19 {strides = array<i32>} : memref<1x8xf32, #tpu.memory_space<vmem>>, vector<1x8xf32>,
    return
  }
}

</mosaic_0001>

<bundles_post_ra>
// kernel: tpu_custom_call.1
= control target key start
LH: loop header
LB: loop body
LE: loop exit
PB: predicated region body
PF: predicated region fallthrough
CT: control target
= control target key end

     0   :  { %s623_s0 = inlined_call_operand.vmem [shape: f32[4,8], index: 0, kind: input, shape index: {}]   ;;  %s624_s1 = inlined_call_operand.vmem [shape: f32[32,4], index: 1, kind: input, shape index: {}]   ;;  %s625_s2 = inlined_call_operand.vmem [shape: f32[32,1], index: 2, kind: input, shape index: {}]   ;;  %s626_s3 = inlined_call_operand.vmem [shape: f32[32,32], index: 3, kind: input, shape index: {}]   ;;  %s627_s4 = inlined_call_operand.vmem [shape: f32[32,1], index: 4, kind: input, shape index: {}]   ;;  %s628_s5 = inlined_call_operand.vmem [shape: f32[1,32], index: 5, kind: input, shape index: {}]   ;;  %s629_s6 = inlined_call_operand.<no memory space> [shape: f32[1,1], index: 6, kind: input, shape index: {}]   ;;  %s630_s7 = inlined_call_operand.hbm [shape: f32[1,8], index: 7, kind: output, shape index: {}]  }
   0x1   :  { %v12_v0 = vstv %s629_s6 }
   0x2   :  { %13 = vst [vmem:[#allocation2] sm:$0x1] %v12_v0 }
   0x3   :  { %v29_v1 = vld [vmem:[%s623_s0] sm:$0xf]  ;;  %vm71_vm0 = vcmask 1043456   ;;  %vm58_vm1 = vcmask 31744   ;;  %v31_v3 = vld [vmem:[%s624_s1 + $0x8] sm:$0xff]  ;;  %v32_v4 = vld [vmem:[%s624_s1 + $0x10] sm:$0xff] }
   0x4   :  { %v30_v2 = vld [vmem:[%s624_s1] sm:$0xff]  ;;  %422 = vmatprep.subr.msk.mxu0 %vm71_vm0, %v29_v1  ;;  %v500_v6 = vmov 0   ;;  %v36_v7 = vld [vmem:[%s625_s2 + $0x10] sm:$0xff]  ;;  %v33_v8 = vld [vmem:[%s624_s1 + $0x18] sm:$0xff] }
   0x5   :  { %424 = vmatprep.mubr.msk.f32.mxu0 %vm58_vm1, %v30_v2  ;;  %v34_v5 = vld [vmem:[%s625_s2] sm:$0xff]  ;;  %423 = vmatpush3.msk.msra.mxu0 %vm71_vm0, %v29_v1  ;;  %v35_v9 = vld [vmem:[%s625_s2 + $0x8] sm:$0xff] }
   0x6   :  { %474 = vset.pattern.permute.xlu0 %v500_v6  ;;  %425 = vmatmul.mubr.msk.f32.vlgmr.msra.gmra.mrb[0].mxu0 %vm58_vm1, %v31_v3 }
   0x7   :  { %40 = vperm.xlu0 %474, %v34_v5   ;;  %427 = vmatprep.mubr.msk.f32.mxu0 %vm58_vm1, %v32_v4 }
   0x8   :  { %475 = vset.pattern.permute.xlu1 %v500_v6 }
   0x9   :  { %14 = vsyncpa [#allocation4], 0  ;;  %50 = vperm.xlu1 %475, %v36_v7   ;;  %v37_v10 = vld [vmem:[%s625_s2 + $0x18] sm:$0xff]  ;;  %v168_v11 = vld [vmem:[%s627_s4] sm:$0xff]  ;;  %vm192_vm2 = vcmask 261120   ;;  %v501_v38 = vmov 0.0|0.0   ;;  %v301_v59 = vlaneseq }
   0xa   :  { %428 = vmatmul.mubr.msk.f32.gmra.mrb[2].mxu0 %vm58_vm1, %v33_v8  ;;  %v169_v12 = vld [vmem:[%s627_s4 + $0x8] sm:$0xff]  ;;  %v170_v13 = vld [vmem:[%s627_s4 + $0x10] sm:$0xff]  ;;  %v171_v14 = vld [vmem:[%s627_s4 + $0x18] sm:$0xff]  ;;  %463 = vmatprep.subr.bf16.mxu0 %v501_v38  ;;  %vm502_vm3 = vmmov 0   ;;  %v503_v39 = vmov 0.0   ;;  %s504_s6 = smov [#allocation3]  }
   0xb   :  { %45 = vperm.xlu0 %474, %v35_v9   ;;  %v295_v15 = vld [vmem:[#allocation2] sm:$0x1]  ;;  %v165_v35 = vld [vmem:[%s626_s3 + $0x8] sm:$0xff]  ;;  %v166_v36 = vld [vmem:[%s626_s3 + $0x10] sm:$0xff]  ;;  %452 = vmatprep.mubr.msk.f32.mxu0 %vm502_vm3, %v503_v39  ;;  %v302_v60 = vshrl.u32 %v301_v59, 7  ;;  %s386_s10 = sshll.u32 %s504_s6, 4  ;;  %s387_s10 = int_to_ptr.vmem [resolvable:$true] %s386_s10 }
   0xc   :  { %v164_v16 = vld [vmem:[%s626_s3] sm:$0xff]  ;;  %v167_v37 = vld [vmem:[%s626_s3 + $0x18] sm:$0xff]  ;;  %vm378_vm4 = vcmask 57344   ;;  %s476_s11 = scalar_lea.vmem %s387_s10, 16  ;;  %s480_s0 = scalar_lea.vmem %s387_s10, 32 }
   0xd   :  { %55 = vperm.xlu1 %475, %v37_v10   ;;  %438 = vmatprep.mubr.msk.f32.mxu1 %vm192_vm2, %v164_v16  ;;  %v294_v58 = vld [vmem:[%s628_s5] sm:$0x1]  ;;  %v303_v61 = vsub.s32 0, %v302_v60  ;;  %p477_p0 = scmp.ne.s32.totalorder %s387_s10, %s476_s11  ;;  %p481_p1 = scmp.lt.s32.totalorder %s387_s10, %s387_s10 }
   0xe   :  { %p482_p2 = scmp.lt.s32.totalorder %s480_s0, %s476_s11 }
   0xf   :  { %174 = vperm.xlu0 %474, %v168_v11  }
  0x10   :  { %p483_p3 = por %p482_p2, %p481_p1 }
  0x11   :  { %179 = vperm.xlu1 %475, %v169_v12  }
  0x12   :  { %p484_p4 = pnand %p483_p3, %p477_p0 }
  0x13   :  { %184 = vperm.xlu0 %474, %v170_v13  }
  0x15   :  { %189 = vperm.xlu1 %475, %v171_v14  }
  0x17   :  { %298 = vperm.xlu0 %474, %v295_v15  }
  0x86   :  { %v41_v17 = vpop.permute.xlu0 %40 }
  0x88   :  { %v51_v18 = vpop.permute.xlu1 %50 }
  0x8a   :  { %v46_v19 = vpop.permute.xlu0 %45 }
  0x8c   :  { %v56_v25 = vpop.permute.xlu1 %55 }
  0x8e   :  { %v175_v41 = vpop.permute.xlu0 %174 }
  0x90   :  { %v180_v40 = vpop.permute.xlu1 %179 }
  0x92   :  { %v185_v50 = vpop.permute.xlu0 %184 }
  0x94   :  { %v190_v47 = vpop.permute.xlu1 %189 }
  0x96   :  { %v299_v62 = vpop.permute.xlu0 %298 }
  0x97   :  { %v304_v63 = vrot.slane %v299_v62, %v303_v61 }
  0xd9   :  { %v426_v20 = vpop.f32.mrb[0].mxu0 }
  0xda   :  { %v147_v21 = vadd.f32 %v426_v20, %v46_v19  ;;  %v141_v22 = vpop.f32.mrb[1].mxu0 }
  0xdb   :  { %v142_v23 = vadd.f32 %v141_v22, %v41_v17 }
  0xdc   :  { %v161_v24 = vmax.f32 %v147_v21, 0.0 }
  0xdd   :  { %v160_v26 = vmax.f32 %v142_v23, 0.0  ;;  %v429_v27 = vpop.f32.mrb[2].mxu0 }
  0xde   :  { %v157_v28 = vadd.f32 %v429_v27, %v56_v25  ;;  %v151_v29 = vpop.f32.mrb[3].mxu0 }
  0xdf   :  { %v152_v30 = vadd.f32 %v151_v29, %v51_v18  ;;  %v455_v31 = vpack.c.bf16 %v161_v24, %v160_v26 }
  0xe0   :  { %v163_v32 = vmax.f32 %v157_v28, 0.0 }
  0xe1   :  { %v162_v33 = vmax.f32 %v152_v30, 0.0  ;;  %456 = vmatprep.subr.bf16.mxu1 %v455_v31 }
  0xe2   :  { %458 = vmatpush3.bf16.msra.mxu1 %v455_v31 }
  0xe3   :  { %v459_v34 = vpack.c.bf16 %v163_v32, %v162_v33 }
  0xe5   :  { %460 = vmatprep.subr.bf16.mxu1 %v459_v34 }
  0xe6   :  { %462 = vmatpush3.bf16.msra.mxu1 %v459_v34 }
  0xe9   :  { %439 = vmatmul.mubr.msk.f32.vlgmr.msra.gmra.mrb[0].mxu1 %vm192_vm2, %v165_v35 }
  0xea   :  { %441 = vmatprep.mubr.msk.f32.mxu1 %vm192_vm2, %v166_v36 }
  0xed   :  { %442 = vmatmul.mubr.msk.f32.gmra.mrb[2].mxu1 %vm192_vm2, %v167_v37 }
 0x1bc   :  { %v440_v42 = vpop.f32.mrb[0].mxu1 }
 0x1bd   :  { %v277_v43 = vadd.f32 %v440_v42, %v180_v40  ;;  %v271_v44 = vpop.f32.mrb[1].mxu1 }
 0x1be   :  { %v272_v45 = vadd.f32 %v271_v44, %v175_v41 }
 0x1bf   :  { %v291_v46 = vmax.f32 %v277_v43, 0.0 }
 0x1c0   :  { %v290_v48 = vmax.f32 %v272_v45, 0.0  ;;  %v443_v49 = vpop.f32.mrb[2].mxu1 }
 0x1c1   :  { %v287_v51 = vadd.f32 %v443_v49, %v190_v47  ;;  %v281_v52 = vpop.f32.mrb[3].mxu1 }
 0x1c2   :  { %v464_v53 = vpack.c.bf16 %v291_v46, %v290_v48  ;;  %v282_v54 = vadd.f32 %v281_v52, %v185_v50 }
 0x1c3   :  { %v293_v55 = vmax.f32 %v287_v51, 0.0 }
 0x1c4   :  { %v292_v56 = vmax.f32 %v282_v54, 0.0  ;;  %465 = vmatpush3.bf16.msra.mxu0 %v464_v53 }
 0x1c5   :  { %466 = vmatprep.subr.bf16.mxu0 %v501_v38 }
 0x1c6   :  { %v467_v57 = vpack.c.bf16 %v293_v55, %v292_v56 }
 0x1c8   :  { %468 = vmatpush3.bf16.msra.mxu0 %v467_v57 }
 0x1cb   :  { %453 = vmatmul.mubr.msk.f32.vlgmr.msra.gmra.mrb[4].mxu0 %vm192_vm2, %v294_v58 }
 0x29e   :  { %v374_v0 = vpop.f32.mrb[4].mxu0 }
 0x29f   :  { %v375_v1 = vadd.f32 %v374_v0, %v304_v63  ;;  %v454_v2 = vpop.f32.mrb[5].mxu0 }
 0x2a1   :  { %379 = vst.msk [vmem:[#allocation3] sm:$0x1] %vm378_vm4, %v375_v1 }
 0x2a2   :  { %487 = shalt.err (!%p484_p4)
}
 0x2a3   :  { %s488_s13 = scalar_lea.hbm %s630_s7, 16 }
 0x2a4   :  { %p489_p5 = scmp.ne.s32.totalorder %s630_s7, %s488_s13  ;;  %p492_p6 = scmp.lt.u32.totalorder %s488_s13, %s630_s7 }
 0x2a6   :  { %p494_p7 = pnand %p492_p6, %p489_p5 }
 0x2a8   :  { %497 = shalt.err (!%p494_p7)
}
 0x2a9   :  { %389 = dma.vmem_to_hbm [thread:$0]  %s387_s10, 16, %s630_s7, [#allocation4]  }
 0x2aa   :  { %498 = dma.done.wait [#allocation4], 16  }
 0x2ab   :  { %499 = vsyncadd [#allocation4], 4294967280 }
 0x2ac   :  { %393 = vsyncpa [#allocation4], 1 }

</bundles_post_ra>
